<compile_context>
chip_gen: v7x
topology: tpu7x:2x2x1
jax: 0.10.0
libtpu: 0.0.40
codegen_flags: <defaults>
</compile_context>

<pallas_src>
import math
import functools

import jax
import jax.numpy as jnp
from jax.experimental import pallas as pl
from jax.experimental.pallas import tpu as pltpu


def _round_up(x, m):
    return ((x + m - 1) // m) * m


# ----------------------------------------------------------------------------
# Kernels
# ----------------------------------------------------------------------------
def _mm_bias_kernel(x_ref, w_ref, b_ref, o_ref):
    """Single-K-block path: whole reduction in one dot, no accumulator."""
    o_ref[...] = (
        jnp.dot(x_ref[...], w_ref[...], preferred_element_type=jnp.float32)
        + b_ref[...]
    ).astype(o_ref.dtype)


def _mm_bias_acc_kernel(x_ref, w_ref, b_ref, o_ref, acc_ref):
    """Tiled matmul with f32 accumulator; grid = (M//tm, N//tn, K//tk)."""
    k = pl.program_id(2)

    @pl.when(k == 0)
    def _():
        # Seed accumulator with the broadcast bias -> no epilogue add needed.
        acc_ref[...] = jnp.broadcast_to(b_ref[...], acc_ref.shape).astype(jnp.float32)

    acc_ref[...] += jnp.dot(
        x_ref[...], w_ref[...], preferred_element_type=jnp.float32
    )

    @pl.when(k == pl.num_programs(2) - 1)
    def _():
        o_ref[...] = acc_ref[...].astype(o_ref.dtype)


# ----------------------------------------------------------------------------
# Wrapper
# ----------------------------------------------------------------------------
@functools.partial(
    jax.jit, static_argnames=("tm", "tn", "tk", "cast_inputs_to_bf16")
)
def gcn_linear(x, weight, bias=None, *, tm=256, tn=512, tk=512,
               cast_inputs_to_bf16=False):
    """output = x @ weight + bias, computed in a Pallas TPU kernel."""
    M, K = x.shape
    K2, N = weight.shape
    assert K == K2, (K, K2)
    out_dtype = x.dtype

    # Clamp tiles to the hardware-granule-rounded problem dims so small layers
    # collapse to one (or few) blocks instead of forcing tiny tiles.
    tm = min(tm, _round_up(M, 8))
    tn = min(tn, _round_up(N, 128))
    tk = min(tk, _round_up(K, 128))

    Mp = _round_up(M, tm)
    Kp = _round_up(K, tk)
    Np = _round_up(N, tn)

    if bias is None:
        bias = jnp.zeros((N,), out_dtype)
    bias2d = bias.reshape(1, N).astype(jnp.float32)

    # Zero-pad up to the tile grid (K padding adds exact zeros to the dot).
    if (Mp, Kp) != (M, K):
        x = jnp.pad(x, ((0, Mp - M), (0, Kp - K)))
    if (Kp, Np) != (K, N):
        weight = jnp.pad(weight, ((0, Kp - K), (0, Np - N)))
    if Np != N:
        bias2d = jnp.pad(bias2d, ((0, 0), (0, Np - N)))

    if cast_inputs_to_bf16:
        # v6e/v7x: bf16-native MXU, half the HBM traffic; accumulation stays f32.
        x = x.astype(jnp.bfloat16)
        weight = weight.astype(jnp.bfloat16)

    nm, nn, nk = Mp // tm, Np // tn, Kp // tk

    if nk == 1:
        # Fused small-K path: 2-D grid, no accumulator scratch, no pl.when.
        out = pl.pallas_call(
            _mm_bias_kernel,
            out_shape=jax.ShapeDtypeStruct((Mp, Np), out_dtype),
            grid_spec=pltpu.PrefetchScalarGridSpec(
                num_scalar_prefetch=0,
                grid=(nm, nn),
                in_specs=[
                    pl.BlockSpec((tm, tk), lambda i, j: (i, 0)),   # x tile
                    pl.BlockSpec((tk, tn), lambda i, j: (0, j)),   # weight tile
                    pl.BlockSpec((1, tn), lambda i, j: (0, j)),    # bias tile
                ],
                out_specs=pl.BlockSpec((tm, tn), lambda i, j: (i, j)),
            ),
            compiler_params=pltpu.CompilerParams(
                dimension_semantics=("parallel", "parallel")
            ),
        )(x, weight, bias2d)
    else:
        out = pl.pallas_call(
            _mm_bias_acc_kernel,
            out_shape=jax.ShapeDtypeStruct((Mp, Np), out_dtype),
            grid_spec=pltpu.PrefetchScalarGridSpec(
                num_scalar_prefetch=0,
                grid=(nm, nn, nk),
                in_specs=[
                    pl.BlockSpec((tm, tk), lambda i, j, k: (i, k)),   # x tile
                    pl.BlockSpec((tk, tn), lambda i, j, k: (k, j)),   # weight tile
                    pl.BlockSpec((1, tn), lambda i, j, k: (0, j)),    # bias tile
                ],
                out_specs=pl.BlockSpec((tm, tn), lambda i, j, k: (i, j)),
                scratch_shapes=[pltpu.VMEM((tm, tn), jnp.float32)],
            ),
            compiler_params=pltpu.CompilerParams(
                dimension_semantics=("parallel", "parallel", "arbitrary")
            ),
        )(x, weight, bias2d)

    if (Mp, Np) != (M, N):
        out = out[:M, :N]
    return out


# ----------------------------------------------------------------------------
# Param init mirroring GCNLinear.reset_parameters()
# ----------------------------------------------------------------------------
def init_gcn_linear_params(key, in_channels, out_channels, with_bias=True):
    """uniform(-stdv, stdv) with stdv = 1/sqrt(in_channels)."""
    stdv = 1.0 / math.sqrt(in_channels)
    kw, kb = jax.random.split(key)
    weight = jax.random.uniform(
        kw, (in_channels, out_channels), jnp.float32, minval=-stdv, maxval=stdv
    )
    if with_bias:
        bias = jax.random.uniform(
            kb, (out_channels,), jnp.float32, minval=-stdv, maxval=stdv
        )
    else:
        bias = None
    return weight, bias


def _ref(x, w, b):
    out = jnp.dot(x, w, precision=jax.lax.Precision.HIGHEST)
    return out if b is None else out + b


if __name__ == "__main__":
    key = jax.random.PRNGKey(0)
    k_x1, k_p1, k_x2, k_p2 = jax.random.split(key, 4)

    # --- test 1: small GCN layer (16 nodes, 32 -> 64) — single-block fast path
    n1, cin1, cout1 = 16, 32, 64
    x1 = jax.random.normal(k_x1, (n1, cin1), jnp.float32)
    w1, b1 = init_gcn_linear_params(k_p1, cin1, cout1)
    out1 = jax.block_until_ready(gcn_linear(x1, w1, b1))
    assert out1.shape == (n1, cout1)
    assert jnp.allclose(out1, _ref(x1, w1, b1), atol=1e-5, rtol=1e-5)

    # --- test 1b: no-bias path
    out1b = jax.block_until_ready(gcn_linear(x1, w1, None))
    assert jnp.allclose(out1b, _ref(x1, w1, None), atol=1e-5, rtol=1e-5)

    # --- test 2: ragged, larger layer -> padding + multi-K accumulator path
    n2, cin2, cout2 = 300, 1100, 260
    x2 = jax.random.normal(k_x2, (n2, cin2), jnp.float32)
    w2, b2 = init_gcn_linear_params(k_p2, cin2, cout2)
    out2 = jax.block_until_ready(gcn_linear(x2, w2, b2))
    assert out2.shape == (n2, cout2)
    assert jnp.allclose(out2, _ref(x2, w2, b2), atol=2e-4, rtol=2e-4)

    # --- test 3: bf16-input path (v6e/v7x MXU-rate option), f32 accumulation
    out3 = jax.block_until_ready(
        gcn_linear(x2, w2, b2, cast_inputs_to_bf16=True)
    )
    assert jnp.allclose(out3, _ref(x2, w2, b2), atol=5e-2, rtol=5e-2)

    print("KERNEL_OK")
</pallas_src>

<mosaic_0001>
module attributes {stable_mosaic.version = 11 : i64} {
  func.func @_mm_bias_kernel(%arg0: i32, %arg1: i32, %arg2: memref<16x128xf32, #tpu.memory_space<vmem>>, %arg3: memref<128x128xf32, #tpu.memory_space<vmem>>, %arg4: memref<1x128xf32, #tpu.memory_space<vmem>>, %arg5: memref<16x128xf32, #tpu.memory_space<vmem>>) attributes {dimension_semantics = [#tpu.dimension_semantics<parallel>, #tpu.dimension_semantics<parallel>], iteration_bounds = array<i64: 1, 1>, scalar_prefetch = 0 : i64, scratch_operands = 0 : i64, tpu.core_type = #tpu.core_type<tc>, window_params = [{transform_indices = @transform_0, window_bounds = array<i64: 16, 128>}, {transform_indices = @transform_1, window_bounds = array<i64: 128, 128>}, {transform_indices = @transform_2, window_bounds = array<i64: 1, 128>}, {transform_indices = @transform_3, window_bounds = array<i64: 16, 128>}]} {
    %c0 = arith.constant 0 : index
    %c0_0 = arith.constant 0 : index
    %0 = vector.load %arg2[%c0, %c0_0] : memref<16x128xf32, #tpu.memory_space<vmem>>, vector<16x128xf32>
    %c0_1 = arith.constant 0 : index
    %c0_2 = arith.constant 0 : index
    %1 = vector.load %arg3[%c0_1, %c0_2] : memref<128x128xf32, #tpu.memory_space<vmem>>, vector<128x128xf32>
    %cst = arith.constant dense<0.000000e+00> : vector<16x128xf32>
    %2 = tpu.matmul %0, %1, %cst {dimension_numbers = #tpu.dot_dimension_numbers<[1], [0], [0], [1], [0, 0, 1, 1], [], []>} : vector<16x128xf32>, vector<128x128xf32>, vector<16x128xf32> -> vector<16x128xf32>
    %c0_3 = arith.constant 0 : index
    %c0_4 = arith.constant 0 : index
    %3 = vector.load %arg4[%c0_3, %c0_4] : memref<1x128xf32, #tpu.memory_space<vmem>>, vector<1x128xf32>
    %4 = vector.broadcast %3 : vector<1x128xf32> to vector<16x128xf32>
    %5 = arith.addf %2, %4 : vector<16x128xf32>
    %c0_5 = arith.constant 0 : index
    %c0_6 = arith.constant 0 : index
    %6 = vector.load %arg5[%c0_5, %c0_6] : memref<16x128xf32, #tpu.memory_space<vmem>>, vector<16x128xf32>
    tpu.vector_store %arg5[%c0_5, %c0_6], %5 {strides = array<i32>} : memref<16x128xf32, #tpu.memory_space<vmem>>, vector<16x128xf32>,
    return
  }
  func.func @transform_0(%arg0: i32, %arg1: i32) -> (i32, i32) {
    %c0_i32 = arith.constant 0 : i32
    %c0_i32_0 = arith.constant 0 : i32
    return %arg0, %c0_i32 : i32, i32
  }
  func.func @transform_1(%arg0: i32, %arg1: i32) -> (i32, i32) {
    %c0_i32 = arith.constant 0 : i32
    %c0_i32_0 = arith.constant 0 : i32
    return %c0_i32, %arg1 : i32, i32
  }
  func.func @transform_2(%arg0: i32, %arg1: i32) -> (i32, i32) {
    %c0_i32 = arith.constant 0 : i32
    %c0_i32_0 = arith.constant 0 : i32
    return %c0_i32, %arg1 : i32, i32
  }
  func.func @transform_3(%arg0: i32, %arg1: i32) -> (i32, i32) {
    %c0_i32 = arith.constant 0 : i32
    return %arg0, %arg1 : i32, i32
  }
}

</mosaic_0001>

<bundles_post_ra>
// kernel: gcn_linear.1
= control target key start
LH: loop header
LB: loop body
LE: loop exit
PB: predicated region body
PF: predicated region fallthrough
CT: control target
= control target key end

     0   :  { %s338_s0 = inlined_call_operand.vmem [shape: f32[16,128], index: 0, kind: input, shape index: {}]   ;;  %s339_s1 = inlined_call_operand.vmem [shape: f32[128,128], index: 1, kind: input, shape index: {}]   ;;  %s340_s2 = inlined_call_operand.vmem [shape: f32[1,128], index: 2, kind: input, shape index: {}]   ;;  %s341_s3 = inlined_call_operand.hbm [shape: f32[16,128], index: 3, kind: output, shape index: {}]  }
   0x1   :  { %v17_v0 = vld [vmem:[%s339_s1] sm:$0xff]  ;;  %v18_v1 = vld [vmem:[%s339_s1 + $0x8] sm:$0xff]  ;;  %v19_v2 = vld [vmem:[%s339_s1 + $0x10] sm:$0xff] }
   0x2   :  { %v187_v3 = vpack.c.bf16 %v18_v1, %v17_v0  ;;  %v20_v4 = vld [vmem:[%s339_s1 + $0x18] sm:$0xff]  ;;  %v21_v6 = vld [vmem:[%s339_s1 + $0x20] sm:$0xff]  ;;  %v22_v7 = vld [vmem:[%s339_s1 + $0x28] sm:$0xff] }
   0x3   :  { %v191_v5 = vpack.c.bf16 %v20_v4, %v19_v2  ;;  %v195_v8 = vpack.c.bf16 %v22_v7, %v21_v6  ;;  %v15_v9 = vld [vmem:[%s338_s0] sm:$0xff]  ;;  %v23_v10 = vld [vmem:[%s339_s1 + $0x30] sm:$0xff]  ;;  %v24_v11 = vld [vmem:[%s339_s1 + $0x38] sm:$0xff] }
   0x4   :  { %188 = vmatprep.subr.bf16.mxu0 %v187_v3  ;;  %184 = vmatprep.mubr.f32.mxu0 %v15_v9 }
   0x5   :  { %190 = vmatpush3.bf16.msra.mxu0 %v187_v3 }
   0x6   :  { %192 = vmatprep.subr.bf16.mxu0 %v191_v5 }
   0x7   :  { %8 = vsyncpa [#allocation3], 0  ;;  %v199_v12 = vpack.c.bf16 %v24_v11, %v23_v10  ;;  %v25_v13 = vld [vmem:[%s339_s1 + $0x40] sm:$0xff]  ;;  %v26_v14 = vld [vmem:[%s339_s1 + $0x48] sm:$0xff]  ;;  %s246_s23 = smov [#allocation2]  }
   0x8   :  { %v203_v15 = vpack.c.bf16 %v26_v14, %v25_v13  ;;  %v27_v16 = vld [vmem:[%s339_s1 + $0x50] sm:$0xff]  ;;  %v28_v17 = vld [vmem:[%s339_s1 + $0x58] sm:$0xff]  ;;  %v29_v19 = vld [vmem:[%s339_s1 + $0x60] sm:$0xff]  ;;  %s122_s24 = sshll.u32 %s246_s23, 4  ;;  %s123_s24 = int_to_ptr.vmem [resolvable:$true] %s122_s24 }
   0x9   :  { %194 = vmatpush3.bf16.msra.mxu0 %v191_v5  ;;  %v207_v18 = vpack.c.bf16 %v28_v17, %v27_v16  ;;  %v30_v20 = vld [vmem:[%s339_s1 + $0x68] sm:$0xff]  ;;  %v31_v22 = vld [vmem:[%s339_s1 + $0x70] sm:$0xff]  ;;  %v32_v23 = vld [vmem:[%s339_s1 + $0x78] sm:$0xff]  ;;  %s222_s1 = scalar_lea.vmem %s123_s24, 256  ;;  %p227_p1 = scmp.lt.s32.totalorder %s123_s24, %s123_s24 }
   0xa   :  { %196 = vmatprep.subr.bf16.mxu0 %v195_v8  ;;  %v211_v21 = vpack.c.bf16 %v30_v20, %v29_v19  ;;  %v215_v24 = vpack.c.bf16 %v32_v23, %v31_v22  ;;  %v16_v25 = vld [vmem:[%s338_s0 + $0x8] sm:$0xff]  ;;  %v133_v26 = vld [vmem:[%s340_s2] ss:$0 sm:$0xff]  ;;  %p223_p0 = scmp.ne.s32.totalorder %s123_s24, %s222_s1  ;;  %p228_p2 = scmp.lt.s32.totalorder %s222_s1, %s222_s1 }
   0xc   :  { %p229_p3 = por %p228_p2, %p227_p1 }
   0xd   :  { %198 = vmatpush3.bf16.msra.mxu0 %v195_v8 }
   0xe   :  { %200 = vmatprep.subr.bf16.mxu0 %v199_v12  ;;  %p230_p4 = pnand %p229_p3, %p223_p0 }
  0x11   :  { %202 = vmatpush3.bf16.msra.mxu0 %v199_v12 }
  0x12   :  { %204 = vmatprep.subr.bf16.mxu0 %v203_v15 }
  0x15   :  { %206 = vmatpush3.bf16.msra.mxu0 %v203_v15 }
  0x16   :  { %208 = vmatprep.subr.bf16.mxu0 %v207_v18 }
  0x19   :  { %210 = vmatpush3.bf16.msra.mxu0 %v207_v18 }
  0x1a   :  { %212 = vmatprep.subr.bf16.mxu0 %v211_v21 }
  0x1d   :  { %214 = vmatpush3.bf16.msra.mxu0 %v211_v21 }
  0x1e   :  { %216 = vmatprep.subr.bf16.mxu0 %v215_v24 }
  0x21   :  { %218 = vmatpush3.bf16.msra.mxu0 %v215_v24 }
  0x24   :  { %185 = vmatmul.mubr.f32.vlgmr.msra.gmra.mrb[0].mxu0 %v16_v25 }
  0xf7   :  { %v186_v27 = vpop.f32.mrb[0].mxu0 }
  0xf8   :  { %v112_v28 = vadd.f32 %v186_v27, %v133_v26  ;;  %v106_v29 = vpop.f32.mrb[1].mxu0 }
  0xf9   :  { %v107_v30 = vadd.f32 %v133_v26, %v106_v29 }
  0xfa   :  { %116 = vst [vmem:[#allocation2 + $0x8] sm:$0xff] %v112_v28 }
  0xfb   :  { %115 = vst [vmem:[#allocation2] sm:$0xff] %v107_v30 }
  0xfc   :  { %233 = shalt.err (!%p230_p4)
}
  0xfd   :  { %s234_s2 = scalar_lea.hbm %s341_s3, 256 }
  0xfe   :  { %p235_p5 = scmp.ne.s32.totalorder %s341_s3, %s234_s2  ;;  %p238_p6 = scmp.lt.u32.totalorder %s234_s2, %s341_s3 }
 0x100   :  { %p240_p7 = pnand %p238_p6, %p235_p5 }
 0x102   :  { %243 = shalt.err (!%p240_p7)
}
 0x103   :  { %s247_s30 = smov 128   ;;  %s248_s4 = smov 8  }
 0x104   :  { %128 = dma.vmem_to_hbm [thread:$0]  %s123_s24, 256, %s341_s3, [#allocation3], %s247_s30, %s247_s30, %s248_s4  }
 0x105   :  { %244 = dma.done.wait [#allocation3], 256  }
 0x106   :  { %245 = vsyncadd [#allocation3], 4294967040 }
 0x107   :  { %132 = vsyncpa [#allocation3], 1 }

</bundles_post_ra>
